<compile_context>
chip_gen: v5e
topology: v5e:2x2
jax: 0.10.0
libtpu: 0.0.40
codegen_flags: <defaults>
</compile_context>

<pallas_src>
import functools

import jax
import jax.numpy as jnp
from jax.experimental import pallas as pl
from jax.experimental.pallas import tpu as pltpu


def _round_up(x, m):
    return ((x + m - 1) // m) * m


# ----------------------------------------------------------------------------
# Fused kernel: grid=(batch_tiles, T//group); weights for a group of layers are
# prefetched by the BlockSpec pipeline, x is carried in f32 VMEM scratch.
# ----------------------------------------------------------------------------
def _fused_resnet_kernel(group, hpad, x0_ref, wc_ref, w2_ref, w3_ref,
                         o_ref, x_carry):
    g = pl.program_id(1)

    @pl.when(g == 0)
    def _():
        x_carry[...] = x0_ref[...]          # (re)load initial state for this batch tile

    x = x_carry[...]                        # f32 carried state (TB, dpad)

    # Static unroll over the `group` layers resident in VMEM this grid step.
    for i in range(group):
        xb = x.astype(jnp.bfloat16)
        # Combined first matmul: x @ [W1 | Ws] (biases folded via const column).
        hs = jnp.dot(xb, wc_ref[i], preferred_element_type=jnp.float32)
        h = jnp.maximum(hs[:, :hpad], 0.0)          # relu(x @ W1 + b1)
        short = hs[:, hpad:]                        # x @ Ws + bs (const col carried)

        h2 = jnp.maximum(
            jnp.dot(h.astype(jnp.bfloat16), w2_ref[i],
                    preferred_element_type=jnp.float32), 0.0)
        y = jnp.dot(h2.astype(jnp.bfloat16), w3_ref[i],
                    preferred_element_type=jnp.float32) + short

        o_ref[i] = y.astype(o_ref.dtype)            # x_t into stacked output
        x = y

    x_carry[...] = x                                # carry to next time group


# ----------------------------------------------------------------------------
# Parameter init (PyTorch-style) and packing into padded, bias-folded bf16 slabs.
# ----------------------------------------------------------------------------
def init_linear(key, fan_in, fan_out):
    kw, kb = jax.random.split(key)
    bound = 1.0 / jnp.sqrt(float(fan_in))
    w = jax.random.uniform(kw, (fan_in, fan_out), jnp.float32, -bound, bound)
    b = jax.random.uniform(kb, (1, fan_out), jnp.float32, -bound, bound)
    return w, b


def init_residual_block(key, in_dim, out_dim, h_dim):
    k1, k2, k3, ks = jax.random.split(key, 4)
    w1, b1 = init_linear(k1, in_dim, h_dim)
    w2, b2 = init_linear(k2, h_dim, h_dim)
    w3, b3 = init_linear(k3, h_dim, out_dim)
    ws, bs = init_linear(ks, in_dim, out_dim)
    return dict(w1=w1, b1=b1, w2=w2, b2=b2, w3=w3, b3=b3, ws=ws, bs=bs)


def init_resnet_surrogate(key, time_steps, in_dim, out_dim, h_dim):
    keys = jax.random.split(key, time_steps)
    layers = []
    for t in range(time_steps):
        d_in = in_dim if t == 0 else out_dim
        layers.append(init_residual_block(keys[t], d_in, out_dim, h_dim))
    return layers


def pack_params(layers, in_dim, out_dim, h_dim, dtype=jnp.bfloat16):
    """Pad feature dims to multiples of 128 (with a spare constant column),
    fold all biases into the matmuls, stack layers along T, cast to bf16."""
    dpad = _round_up(max(in_dim, out_dim) + 1, 128)   # carried / output dim
    hpad = _round_up(h_dim + 1, 128)                  # hidden dim
    cconst = dpad - 1                                 # constant-1 column of x
    hconst = hpad - 1                                 # constant-1 column of h

    wc_list, w2_list, w3_list = [], [], []
    for p in layers:
        d_in = p["w1"].shape[0]

        # [W1 | Ws] with b1|bs folded into the const row + 1.0 pass-throughs.
        w1p = jnp.zeros((dpad, hpad), jnp.float32)
        w1p = w1p.at[:d_in, :h_dim].set(p["w1"])
        w1p = w1p.at[cconst, :h_dim].set(p["b1"][0])
        w1p = w1p.at[cconst, hconst].set(1.0)         # keep const alive in h

        wsp = jnp.zeros((dpad, dpad), jnp.float32)
        wsp = wsp.at[:d_in, :out_dim].set(p["ws"])
        wsp = wsp.at[cconst, :out_dim].set(p["bs"][0])
        wsp = wsp.at[cconst, cconst].set(1.0)         # keep const alive in carried y

        wc_list.append(jnp.concatenate([w1p, wsp], axis=1))

        # W2 with b2 folded + const pass-through.
        w2p = jnp.zeros((hpad, hpad), jnp.float32)
        w2p = w2p.at[:h_dim, :h_dim].set(p["w2"])
        w2p = w2p.at[hconst, :h_dim].set(p["b2"][0])
        w2p = w2p.at[hconst, hconst].set(1.0)
        w2_list.append(w2p)

        # W3 with b3 folded (const column of y comes from the shortcut slab).
        w3p = jnp.zeros((hpad, dpad), jnp.float32)
        w3p = w3p.at[:h_dim, :out_dim].set(p["w3"])
        w3p = w3p.at[hconst, :out_dim].set(p["b3"][0])
        w3_list.append(w3p)

    return dict(wc=jnp.stack(wc_list).astype(dtype),
                w2=jnp.stack(w2_list).astype(dtype),
                w3=jnp.stack(w3_list).astype(dtype))


# ----------------------------------------------------------------------------
# Forward pass: one pallas_call over grid=(batch_tiles, T//group).
# ----------------------------------------------------------------------------
@functools.partial(jax.jit, static_argnames=("out_dim", "group"))
def resnet_surrogate_forward(x, wc, w2, w3, *, out_dim, group=1):
    B, in_dim = x.shape
    T = wc.shape[0]
    dpad = wc.shape[1]
    hpad = w2.shape[-1]
    cconst = dpad - 1
    assert T % group == 0, (T, group)

    # Batch padding / tiling: multiple of 16 (bf16 operand tile); cap tile at 256
    # so large batches get a genuinely parallel leading grid axis (v7x megacore).
    if B <= 256:
        bpad = max(_round_up(B, 16), 16)
        tb = bpad
    else:
        bpad = _round_up(B, 256)
        tb = 256

    x_pad = jnp.zeros((bpad, dpad), jnp.float32)
    x_pad = x_pad.at[:B, :in_dim].set(x.astype(jnp.float32))
    x_pad = x_pad.at[:B, cconst].set(1.0)     # constant column driving folded biases
    # (padded rows stay all-zero, so they remain exactly zero through the recurrence)

    kernel = functools.partial(_fused_resnet_kernel, group, hpad)

    out_padded = pl.pallas_call(
        kernel,
        out_shape=jax.ShapeDtypeStruct((T, bpad, dpad), jnp.float32),
        grid_spec=pltpu.PrefetchScalarGridSpec(
            num_scalar_prefetch=0,
            grid=(bpad // tb, T // group),
            in_specs=[
                pl.BlockSpec((tb, dpad), lambda b, g: (b, 0)),                 # x0 tile
                pl.BlockSpec((group, dpad, hpad + dpad), lambda b, g: (g, 0, 0)),  # [W1|Ws]
                pl.BlockSpec((group, hpad, hpad), lambda b, g: (g, 0, 0)),         # W2
                pl.BlockSpec((group, hpad, dpad), lambda b, g: (g, 0, 0)),         # W3
            ],
            out_specs=pl.BlockSpec((group, tb, dpad), lambda b, g: (g, b, 0)),
            scratch_shapes=[pltpu.VMEM((tb, dpad), jnp.float32)],              # carried x
        ),
        compiler_params=pltpu.CompilerParams(
            # batch tiles independent (sharded across TCs on v7x); time is a carry.
            dimension_semantics=("parallel", "arbitrary"),
            # Explicit scoped-VMEM budget; fits v5e/v6e/v7x physical limits.
            # TODO(synk): for realistic h_dim/out_dim on v7x (64 MiB VMEM) add grid
            #             axes over the hidden/output dims of the weight slabs.
            vmem_limit_bytes=48 * 1024 * 1024),
    )(x_pad, wc, w2, w3)

    # [T, Bpad, Dpad] -> [B, T, out_dim]  (single cheap slice + transpose)
    return jnp.transpose(out_padded[:, :B, :out_dim], (1, 0, 2))


# ----------------------------------------------------------------------------
# Pure-JAX reference for correctness checking (compute_dtype=bf16 matches the
# kernel's bf16-operand / f32-accumulate arithmetic).
# ----------------------------------------------------------------------------
def reference_forward(x, layers, compute_dtype=jnp.float32):
    def mm(a, w):
        return jnp.dot(a.astype(compute_dtype), w.astype(compute_dtype),
                       preferred_element_type=jnp.float32)

    def cb(b):
        return b.astype(compute_dtype).astype(jnp.float32)

    sol = []
    for p in layers:
        h = jnp.maximum(mm(x, p["w1"]) + cb(p["b1"]), 0.0)
        h = jnp.maximum(mm(h, p["w2"]) + cb(p["b2"]), 0.0)
        x = mm(h, p["w3"]) + cb(p["b3"]) + (mm(x, p["ws"]) + cb(p["bs"]))
        sol.append(x)
    return jnp.stack(sol, axis=1)


if __name__ == "__main__":
    time_steps, in_dim, out_dim, h_dim = 4, 16, 16, 32
    batch = 8
    group = 2   # layers per grid step (must divide time_steps)

    key = jax.random.PRNGKey(0)
    k_params, k_x = jax.random.split(key)

    layers = init_resnet_surrogate(k_params, time_steps, in_dim, out_dim, h_dim)
    x = jax.random.normal(k_x, (batch, in_dim), jnp.float32)

    packed = pack_params(layers, in_dim, out_dim, h_dim)

    out = resnet_surrogate_forward(x, packed["wc"], packed["w2"], packed["w3"],
                                   out_dim=out_dim, group=group)
    out = jax.block_until_ready(out)

    assert out.shape == (batch, time_steps, out_dim), out.shape

    # Compare against a bf16-matched reference (same operand precision, f32 accum).
    ref = reference_forward(x, layers, compute_dtype=jnp.bfloat16)
    max_err = float(jnp.max(jnp.abs(out - ref)))
    assert jnp.allclose(out, ref, atol=1e-2, rtol=1e-2), max_err

    print("KERNEL_OK")
</pallas_src>

<mosaic_0001>
module attributes {stable_mosaic.version = 11 : i64} {
  func.func @_fused_resnet_kernel(%arg0: i32, %arg1: i32, %arg2: memref<16x128xf32, #tpu.memory_space<vmem>>, %arg3: memref<2x128x256xbf16, #tpu.memory_space<vmem>>, %arg4: memref<2x128x128xbf16, #tpu.memory_space<vmem>>, %arg5: memref<2x128x128xbf16, #tpu.memory_space<vmem>>, %arg6: memref<2x16x128xf32, #tpu.memory_space<vmem>>, %arg7: memref<16x128xf32, #tpu.memory_space<vmem>>) attributes {dimension_semantics = [#tpu.dimension_semantics<parallel>, #tpu.dimension_semantics<arbitrary>], iteration_bounds = array<i64: 1, 2>, scalar_prefetch = 0 : i64, scratch_operands = 1 : i64, tpu.core_type = #tpu.core_type<tc>, window_params = [{transform_indices = @transform_0, window_bounds = array<i64: 16, 128>}, {transform_indices = @transform_1, window_bounds = array<i64: 2, 128, 256>}, {transform_indices = @transform_2, window_bounds = array<i64: 2, 128, 128>}, {transform_indices = @transform_3, window_bounds = array<i64: 2, 128, 128>}, {transform_indices = @transform_4, window_bounds = array<i64: 2, 16, 128>}]} {
    %c0_i32 = arith.constant 0 : i32
    %0 = arith.cmpi eq, %arg1, %c0_i32 : i32
    %1 = arith.extui %0 : i1 to i32
    %c0_i32_0 = arith.constant 0 : i32
    %2 = arith.cmpi ne, %1, %c0_i32_0 : i32
    scf.if %2 {
      %c0_36 = arith.constant 0 : index
      %c0_37 = arith.constant 0 : index
      %49 = vector.load %arg2[%c0_36, %c0_37] : memref<16x128xf32, #tpu.memory_space<vmem>>, vector<16x128xf32>
      %c0_38 = arith.constant 0 : index
      %c0_39 = arith.constant 0 : index
      %50 = vector.load %arg7[%c0_38, %c0_39] : memref<16x128xf32, #tpu.memory_space<vmem>>, vector<16x128xf32>
      tpu.vector_store %arg7[%c0_38, %c0_39], %49 {strides = array<i32>} : memref<16x128xf32, #tpu.memory_space<vmem>>, vector<16x128xf32>,
    } else {
    }
    %c0 = arith.constant 0 : index
    %c0_1 = arith.constant 0 : index
    %3 = vector.load %arg7[%c0, %c0_1] : memref<16x128xf32, #tpu.memory_space<vmem>>, vector<16x128xf32>
    %4 = arith.truncf %3 : vector<16x128xf32> to vector<16x128xbf16>
    %c0_2 = arith.constant 0 : index
    %c0_3 = arith.constant 0 : index
    %c0_4 = arith.constant 0 : index
    %5 = vector.load %arg3[%c0_2, %c0_3, %c0_4] : memref<2x128x256xbf16, #tpu.memory_space<vmem>>, vector<1x128x256xbf16>
    %6 = vector.shape_cast %5 : vector<1x128x256xbf16> to vector<128x256xbf16>
    %cst = arith.constant dense<0.000000e+00> : vector<16x256xf32>
    %7 = tpu.matmul %4, %6, %cst {dimension_numbers = #tpu.dot_dimension_numbers<[1], [0], [0], [1], [0, 0, 1, 1], [], []>} : vector<16x128xbf16>, vector<128x256xbf16>, vector<16x256xf32> -> vector<16x256xf32>
    %8 = vector.extract_strided_slice %7 {offsets = [0, 0], sizes = [16, 128], strides = [1, 1]} : vector<16x256xf32> to vector<16x128xf32>
    %cst_5 = arith.constant 0.000000e+00 : f32
    %9 = vector.broadcast %cst_5 : f32 to vector<16x128xf32>
    %10 = arith.maximumf %8, %9 : vector<16x128xf32>
    %11 = vector.extract_strided_slice %7 {offsets = [0, 128], sizes = [16, 128], strides = [1, 1]} : vector<16x256xf32> to vector<16x128xf32>
    %12 = arith.truncf %10 : vector<16x128xf32> to vector<16x128xbf16>
    %c0_6 = arith.constant 0 : index
    %c0_7 = arith.constant 0 : index
    %c0_8 = arith.constant 0 : index
    %13 = vector.load %arg4[%c0_6, %c0_7, %c0_8] : memref<2x128x128xbf16, #tpu.memory_space<vmem>>, vector<1x128x128xbf16>
    %14 = vector.shape_cast %13 : vector<1x128x128xbf16> to vector<128x128xbf16>
    %cst_9 = arith.constant dense<0.000000e+00> : vector<16x128xf32>
    %15 = tpu.matmul %12, %14, %cst_9 {dimension_numbers = #tpu.dot_dimension_numbers<[1], [0], [0], [1], [0, 0, 1, 1], [], []>} : vector<16x128xbf16>, vector<128x128xbf16>, vector<16x128xf32> -> vector<16x128xf32>
    %cst_10 = arith.constant 0.000000e+00 : f32
    %16 = vector.broadcast %cst_10 : f32 to vector<16x128xf32>
    %17 = arith.maximumf %15, %16 : vector<16x128xf32>
    %18 = arith.truncf %17 : vector<16x128xf32> to vector<16x128xbf16>
    %c0_11 = arith.constant 0 : index
    %c0_12 = arith.constant 0 : index
    %c0_13 = arith.constant 0 : index
    %19 = vector.load %arg5[%c0_11, %c0_12, %c0_13] : memref<2x128x128xbf16, #tpu.memory_space<vmem>>, vector<1x128x128xbf16>
    %20 = vector.shape_cast %19 : vector<1x128x128xbf16> to vector<128x128xbf16>
    %cst_14 = arith.constant dense<0.000000e+00> : vector<16x128xf32>
    %21 = tpu.matmul %18, %20, %cst_14 {dimension_numbers = #tpu.dot_dimension_numbers<[1], [0], [0], [1], [0, 0, 1, 1], [], []>} : vector<16x128xbf16>, vector<128x128xbf16>, vector<16x128xf32> -> vector<16x128xf32>
    %22 = arith.addf %21, %11 : vector<16x128xf32>
    %c0_15 = arith.constant 0 : index
    %c0_16 = arith.constant 0 : index
    %c0_17 = arith.constant 0 : index
    %23 = vector.load %arg6[%c0_15, %c0_16, %c0_17] : memref<2x16x128xf32, #tpu.memory_space<vmem>>, vector<1x16x128xf32>
    %24 = vector.shape_cast %23 : vector<1x16x128xf32> to vector<16x128xf32>
    %25 = vector.shape_cast %22 : vector<16x128xf32> to vector<1x16x128xf32>
    tpu.vector_store %arg6[%c0_15, %c0_16, %c0_17], %25 {strides = array<i32>} : memref<2x16x128xf32, #tpu.memory_space<vmem>>, vector<1x16x128xf32>,
    %26 = arith.truncf %22 : vector<16x128xf32> to vector<16x128xbf16>
    %c1 = arith.constant 1 : index
    %c0_18 = arith.constant 0 : index
    %c0_19 = arith.constant 0 : index
    %27 = vector.load %arg3[%c1, %c0_18, %c0_19] : memref<2x128x256xbf16, #tpu.memory_space<vmem>>, vector<1x128x256xbf16>
    %28 = vector.shape_cast %27 : vector<1x128x256xbf16> to vector<128x256xbf16>
    %cst_20 = arith.constant dense<0.000000e+00> : vector<16x256xf32>
    %29 = tpu.matmul %26, %28, %cst_20 {dimension_numbers = #tpu.dot_dimension_numbers<[1], [0], [0], [1], [0, 0, 1, 1], [], []>} : vector<16x128xbf16>, vector<128x256xbf16>, vector<16x256xf32> -> vector<16x256xf32>
    %30 = vector.extract_strided_slice %29 {offsets = [0, 0], sizes = [16, 128], strides = [1, 1]} : vector<16x256xf32> to vector<16x128xf32>
    %cst_21 = arith.constant 0.000000e+00 : f32
    %31 = vector.broadcast %cst_21 : f32 to vector<16x128xf32>
    %32 = arith.maximumf %30, %31 : vector<16x128xf32>
    %33 = vector.extract_strided_slice %29 {offsets = [0, 128], sizes = [16, 128], strides = [1, 1]} : vector<16x256xf32> to vector<16x128xf32>
    %34 = arith.truncf %32 : vector<16x128xf32> to vector<16x128xbf16>
    %c1_22 = arith.constant 1 : index
    %c0_23 = arith.constant 0 : index
    %c0_24 = arith.constant 0 : index
    %35 = vector.load %arg4[%c1_22, %c0_23, %c0_24] : memref<2x128x128xbf16, #tpu.memory_space<vmem>>, vector<1x128x128xbf16>
    %36 = vector.shape_cast %35 : vector<1x128x128xbf16> to vector<128x128xbf16>
    %cst_25 = arith.constant dense<0.000000e+00> : vector<16x128xf32>
    %37 = tpu.matmul %34, %36, %cst_25 {dimension_numbers = #tpu.dot_dimension_numbers<[1], [0], [0], [1], [0, 0, 1, 1], [], []>} : vector<16x128xbf16>, vector<128x128xbf16>, vector<16x128xf32> -> vector<16x128xf32>
    %cst_26 = arith.constant 0.000000e+00 : f32
    %38 = vector.broadcast %cst_26 : f32 to vector<16x128xf32>
    %39 = arith.maximumf %37, %38 : vector<16x128xf32>
    %40 = arith.truncf %39 : vector<16x128xf32> to vector<16x128xbf16>
    %c1_27 = arith.constant 1 : index
    %c0_28 = arith.constant 0 : index
    %c0_29 = arith.constant 0 : index
    %41 = vector.load %arg5[%c1_27, %c0_28, %c0_29] : memref<2x128x128xbf16, #tpu.memory_space<vmem>>, vector<1x128x128xbf16>
    %42 = vector.shape_cast %41 : vector<1x128x128xbf16> to vector<128x128xbf16>
    %cst_30 = arith.constant dense<0.000000e+00> : vector<16x128xf32>
    %43 = tpu.matmul %40, %42, %cst_30 {dimension_numbers = #tpu.dot_dimension_numbers<[1], [0], [0], [1], [0, 0, 1, 1], [], []>} : vector<16x128xbf16>, vector<128x128xbf16>, vector<16x128xf32> -> vector<16x128xf32>
    %44 = arith.addf %43, %33 : vector<16x128xf32>
    %c1_31 = arith.constant 1 : index
    %c0_32 = arith.constant 0 : index
    %c0_33 = arith.constant 0 : index
    %45 = vector.load %arg6[%c1_31, %c0_32, %c0_33] : memref<2x16x128xf32, #tpu.memory_space<vmem>>, vector<1x16x128xf32>
    %46 = vector.shape_cast %45 : vector<1x16x128xf32> to vector<16x128xf32>
    %47 = vector.shape_cast %44 : vector<16x128xf32> to vector<1x16x128xf32>
    tpu.vector_store %arg6[%c1_31, %c0_32, %c0_33], %47 {strides = array<i32>} : memref<2x16x128xf32, #tpu.memory_space<vmem>>, vector<1x16x128xf32>,
    %c0_34 = arith.constant 0 : index
    %c0_35 = arith.constant 0 : index
    %48 = vector.load %arg7[%c0_34, %c0_35] : memref<16x128xf32, #tpu.memory_space<vmem>>, vector<16x128xf32>
    tpu.vector_store %arg7[%c0_34, %c0_35], %44 {strides = array<i32>} : memref<16x128xf32, #tpu.memory_space<vmem>>, vector<16x128xf32>,
    return
  }
  func.func @transform_0(%arg0: i32, %arg1: i32) -> (i32, i32) {
    %c0_i32 = arith.constant 0 : i32
    %c0_i32_0 = arith.constant 0 : i32
    return %arg0, %c0_i32 : i32, i32
  }
  func.func @transform_1(%arg0: i32, %arg1: i32) -> (i32, i32, i32) {
    %c0_i32 = arith.constant 0 : i32
    %c0_i32_0 = arith.constant 0 : i32
    %c0_i32_1 = arith.constant 0 : i32
    return %arg1, %c0_i32, %c0_i32_0 : i32, i32, i32
  }
  func.func @transform_2(%arg0: i32, %arg1: i32) -> (i32, i32, i32) {
    %c0_i32 = arith.constant 0 : i32
    %c0_i32_0 = arith.constant 0 : i32
    %c0_i32_1 = arith.constant 0 : i32
    return %arg1, %c0_i32, %c0_i32_0 : i32, i32, i32
  }
  func.func @transform_3(%arg0: i32, %arg1: i32) -> (i32, i32, i32) {
    %c0_i32 = arith.constant 0 : i32
    %c0_i32_0 = arith.constant 0 : i32
    %c0_i32_1 = arith.constant 0 : i32
    return %arg1, %c0_i32, %c0_i32_0 : i32, i32, i32
  }
  func.func @transform_4(%arg0: i32, %arg1: i32) -> (i32, i32, i32) {
    %c0_i32 = arith.constant 0 : i32
    %c0_i32_0 = arith.constant 0 : i32
    return %arg1, %arg0, %c0_i32 : i32, i32, i32
  }
}

</mosaic_0001>

<bundles_post_ra>
// kernel: resnet_surrogate_forward.1
= control target key start
LH: loop header
LB: loop body
LE: loop exit
PB: predicated region body
PF: predicated region fallthrough
CT: control target
= control target key end

     0   :  { %s1987_s0 = inlined_call_operand.vmem [shape: f32[16,128], index: 0, kind: input, shape index: {}]   ;;  %s1988_s1 = inlined_call_operand.hbm [shape: bf16[4,128,256], index: 1, kind: input, shape index: {}]   ;;  %s1989_s2 = inlined_call_operand.hbm [shape: bf16[4,128,128], index: 2, kind: input, shape index: {}]   ;;  %s1990_s3 = inlined_call_operand.hbm [shape: bf16[4,128,128], index: 3, kind: input, shape index: {}]   ;;  %s1991_s4 = inlined_call_operand.vmem [shape: f32[4,16,128], index: 4, kind: output, shape index: {}]  }
   0x1   :  { %1993 = sst [smem:[#allocation10_spill]] %s1989_s2 }
   0x2   :  { %1994 = sst [smem:[#allocation11_spill]] %s1990_s3 }
   0x3   :  { %9 = vsyncpa [#allocation4], 0 }
   0x4   :  { %11 = vsyncpa [#allocation4 + $0x1], 0 }
   0x5   :  { %12 = vsyncpa [#allocation6], 0 }
   0x6   :  { %14 = vsyncpa [#allocation6 + $0x1], 0  ;;  %s1750_s15 = smov 0   ;;  %s1752_s16 = smov 0  }
   0x7   :  { %s1754_s17 = smov 0   ;;  %s1756_s18 = smov 0  }
   0x8   :  { %s1758_s19 = smov 0   ;;  %s1760_s20 = smov 0  }
   0x9 LB: > { %s1992_s21 = sadd.s32 4294967295, %s1719_s20   ;;  %s29_s22 = sadd.s32 1, %s1715_s19  ;;  %s1719_s20 = sphi %s1760_s20, %s20_s20   ;;  %s1715_s19 = sphi %s1758_s19, %s2005_s19   ;;  %s1711_s18 = sphi %s1756_s18, %s2004_s18   ;;  %s1707_s17 = sphi %s1754_s17, %s2003_s17   ;;  %s1703_s16 = sphi %s1752_s16, %s2002_s16   ;;  %s1699_s15 = sphi %s1750_s15, %s2001_s15  }
   0xa   : > { %p30_p0 = scmp.ge.s32.totalorder %s29_s22, 2  ;;  %s65_s23 = sadd.s32 1, %s1707_s17 }
   0xb   : > { %p72_p1 = scmp.ne.s32.totalorder %s1707_s17, %s1703_s16  ;;  %p73_p2 = scmp.eq.s32.totalorder %s1719_s20, 0 }
   0xc   : > { %s2007_s22 = smov (%p30_p0, %s29_s22), 0  ;;  %p78_p4 = scmp.ne.s32.totalorder %s1703_s16, %s1699_s15 }
   0xd   : > { %p74_p3 = por %p73_p2, %p72_p1  ;;  %s62_s24 = ssub.s32 %s1715_s19, %s2007_s22 }
   0xe   : > { %p79_p5 = scmp.eq.s32.totalorder %s1992_s21, 0  ;;  %p63_p6 = scmp.eq.s32.totalorder %s62_s24, 0 }
   0xf   : > { %p1522_p8 = scmp.lt.s32.totalorder %s1719_s20, 2  ;;  %s1800_s27 = sand.u32 1, %s1707_s17  }
  0x10   : > { %p1791_p7 = por %p79_p5, %p78_p4  ;;  %s214_s29 = sand.u32 1, %s1719_s20  }
  0x11   : > { %s1797_s26 = scalar_select %p63_p6, %s1707_s17, %s65_s23  }
  0x12   : > { %p1802_p9 = pnand %p1522_p8, %p74_p3  ;;  %s1111_s30 = sshll.u32 %s1800_s27, 7 }
  0x13   : > { %s1438_s5 = sshll.u32 %s1715_s19, 7  ;;  %s1997_s2 = sld [smem:[#allocation10_spill]] }
  0x14   : > { %s218_s9 = scalar_lea.vmem [#allocation5], %s1111_s30  ;;  %s1812_s12 = scalar_lea.sflag [#allocation6], %s214_s29 }
  0x15   : > { %s227_s10 = sshll.u32 %s218_s9, 4  ;;  %s1721_s13 = smov 64   ;;  %s228_s10 = int_to_ptr.vmem [resolvable:$true] %s227_s10 }
  0x16   : > { %s1722_s14 = smov 4   ;;  %s1998_s3 = sld [smem:[#allocation11_spill]] }
  0x17   : > { %s241_s6 = scalar_lea.vmem [#allocation7], %s1111_s30  ;;  %p1119_p10 = scmp.ge.s32.totalorder %s1719_s20, 1 }
  0x18   : > { %s250_s7 = sshll.u32 %s241_s6, 4  ;;  %p258_p11 = scmp.lt.s32.totalorder %s1719_s20, 3  ;;  %s251_s7 = int_to_ptr.vmem [resolvable:$true] %s250_s7 }
  0x19   : > { %s224_s8 = scalar_lea.hbm %s1997_s2, %s1438_s5  ;;  %s192_s6 = scalar_lea.sflag [#allocation4], %s1800_s27 }
  0x1a   : > { %s225_s11 = sshll.u32 %s224_s8, 4  ;;  %p1822_p12 = pnand %p1119_p10, %p258_p11  ;;  %s226_s11 = int_to_ptr.hbm [resolvable:$true] %s225_s11 }
  0x1b   : > { %1518 = dma.hbm_to_vmem [thread:$0]  (!%p1802_p9), %s226_s11, 2048, %s228_s10, %s1812_s12, %s1721_s13, %s1721_s13, %s1722_s14  }
  0x1c   : > { %s247_s24 = scalar_lea.hbm %s1998_s3, %s1438_s5  ;;  %s1107_s8 = sshll.u32 %s1800_s27, 8 }
  0x1d   : > { %s248_s9 = sshll.u32 %s247_s24, 4  ;;  %s1436_s10 = sshll.u32 %s1715_s19, 8  ;;  %s249_s9 = int_to_ptr.hbm [resolvable:$true] %s248_s9 }
  0x1e   : > { %s201_s30 = scalar_lea.hbm %s1988_s1, %s1436_s10  ;;  %s195_s5 = scalar_lea.vmem [#allocation3], %s1107_s8 }
  0x1f   : > { %s204_s23 = sshll.u32 %s195_s5, 4  ;;  %s202_s24 = sshll.u32 %s201_s30, 4  ;;  %s205_s23 = int_to_ptr.vmem [resolvable:$true] %s204_s23  ;;  %s203_s24 = int_to_ptr.hbm [resolvable:$true] %s202_s24 }
  0x20   : > { %s1723_s21 = smov 128   ;;  %s1724_s2 = smov 8  }
  0x21   : > { %1515 = dma.hbm_to_vmem [thread:$0]  (!%p1802_p9), %s203_s24, 4096, %s205_s23, %s192_s6, %s1723_s21, %s1723_s21, %s1724_s2  }
  0x22   : > { %1521 = dma.hbm_to_vmem [thread:$0]  (!%p1802_p9), %s249_s9, 2048, %s251_s7, %s1812_s12, %s1721_s13, %s1721_s13, %s1722_s14  }
  0x23   : > { %262 = sbr.rel (%p1822_p12) target bundleno = 942 (0x3ae), region = 36  ;;  %s264_s3 = sand.u32 (!%p1822_p12), 1, %s1703_s16  }
  0x24   : > { %s1120_s11 = sshll.u32 (!%p1822_p12), %s264_s3, 8  ;;  %s265_s10 = scalar_lea.sflag (!%p1822_p12), [#allocation4], %s264_s3 }
  0x25   : > { %s1840_s8 = scalar_lea.vmem (!%p1822_p12), [#allocation3], %s1120_s11 }
  0x28   : > { %1690 = dma.done.wait (%p1791_p7), %s265_s10, 4096  }
  0x29   : > { %1692 = vsyncadd (%p1791_p7), %s265_s10, 4294963200  ;;  %s2000_s27 = sadd.s32 4294967295, %s1719_s20   ;;  %s1121_s21 = sshll.u32 %s264_s3, 7 }
  0x2a   : > { %s274_s2 = sand.u32 1, %s2000_s27   ;;  %s1848_s12 = scalar_lea.vmem [#allocation5], %s1121_s21 }
  0x2b   : > { %s275_s28 = scalar_lea.sflag [#allocation6], %s274_s2 }
  0x2c   : > { %1694 = dma.done.wait (%p1791_p7), %s275_s28, 4096  }
  0x2d   : > { %1696 = vsyncadd (%p1791_p7), %s275_s28, 4294963200  ;;  %s1123_s13 = sshll.u32 %s1711_s18, 1  ;;  %s1860_s15 = scalar_lea.vmem [#allocation7], %s1121_s21 }
  0x2e   : > { %p345_p13 = scmp.lt.s32.totalorder %s1123_s13, 3  ;;  %p1126_p0 = scmp.ne.s32.totalorder %s1711_s18, 0 }
  0x30   : > { %s2009_s13 = smov (!%p345_p13, %s1123_s13), 3  ;;  %358 = sbr.rel (%p1126_p0) target bundleno = 56 (0x38), region = 52 }
  0x31   : > { %s1441_s14 = sshll.u32 %s2009_s13, 4 }
  0x32   : > { %s1858_s29 = scalar_lea.vmem %s1991_s4, %s1441_s14 }
  0x35   : > { %v359_v0 = vld [vmem:[%s1987_s0] sm:$0xff]  ;;  %v360_v1 = vld [vmem:[%s1987_s0 + $0x8] sm:$0xff] }
  0x36   : > { %361 = vst [vmem:[#allocation2] sm:$0xff] %v359_v0 }
  0x37   : > { %362 = vst [vmem:[#allocation2 + $0x8] sm:$0xff] %v360_v1 }
  0x38 PF: > { %v1185_v2 = vld [vmem:[%s1840_s8 + $0x70] sm:$0xf]  ;;  %v1457_v3 = vld [vmem:[%s1840_s8 + $0x74] sm:$0xf0]  ;;  %v1177_v4 = vld [vmem:[%s1840_s8 + $0x60] sm:$0xf] }
  0x39   : > { %v1186_v5 = vor.u32 %v1457_v3, %v1185_v2  ;;  %v1455_v6 = vld [vmem:[%s1840_s8 + $0x64] sm:$0xf0]  ;;  %v1169_v8 = vld [vmem:[%s1840_s8 + $0x50] sm:$0xf]  ;;  %v1453_v9 = vld [vmem:[%s1840_s8 + $0x54] sm:$0xf0] }
  0x3a   : > { %v1178_v7 = vor.u32 %v1455_v6, %v1177_v4  ;;  %v1465_v10 = vld [vmem:[%s1848_s12 + $0x38] sm:$0xff]  ;;  %v1170_v11 = vor.u32 %v1453_v9, %v1169_v8  ;;  %v1161_v12 = vld [vmem:[%s1840_s8 + $0x40] sm:$0xf]  ;;  %v1451_v13 = vld [vmem:[%s1840_s8 + $0x44] sm:$0xf0] }
  0x3b   : > { %462 = vmatpush.bf16.msra.mxu0 %v1186_v5  ;;  %557 = vmatpush.bf16.msra.mxu2 %v1465_v10  ;;  %v1464_v14 = vld [vmem:[%s1848_s12 + $0x30] sm:$0xff]  ;;  %v1162_v15 = vor.u32 %v1451_v13, %v1161_v12  ;;  %v1449_v17 = vld [vmem:[%s1840_s8 + $0x34] sm:$0xf0]  ;;  %v1463_v18 = vld [vmem:[%s1848_s12 + $0x28] sm:$0xff] }
  0x3c   : > { %v1153_v16 = vld [vmem:[%s1840_s8 + $0x30] sm:$0xf]  ;;  %v1145_v20 = vld [vmem:[%s1840_s8 + $0x20] sm:$0xf]  ;;  %v1447_v21 = vld [vmem:[%s1840_s8 + $0x24] sm:$0xf0] }
  0x3d   : > { %v1154_v19 = vor.u32 %v1449_v17, %v1153_v16  ;;  %v1462_v22 = vld [vmem:[%s1848_s12 + $0x20] sm:$0xff]  ;;  %v1146_v23 = vor.u32 %v1447_v21, %v1145_v20  ;;  %v1137_v24 = vld [vmem:[%s1840_s8 + $0x10] sm:$0xf]  ;;  %v1445_v25 = vld [vmem:[%s1840_s8 + $0x14] sm:$0xf0] }
  0x3e   : > { %v1461_v26 = vld [vmem:[%s1848_s12 + $0x18] sm:$0xff]  ;;  %v1138_v27 = vor.u32 %v1445_v25, %v1137_v24  ;;  %v1129_v28 = vld [vmem:[%s1840_s8] sm:$0xf]  ;;  %v1443_v29 = vld [vmem:[%s1840_s8 + $0x4] sm:$0xf0] }
  0x3f   : > { %463 = vmatpush.bf16.msra.mxu0 %v1178_v7  ;;  %558 = vmatpush.bf16.msra.mxu2 %v1464_v14  ;;  %v1130_v30 = vor.u32 %v1443_v29, %v1129_v28  ;;  %v363_v31 = vld [vmem:[#allocation2] sm:$0xff]  ;;  %v364_v32 = vld [vmem:[#allocation2 + $0x8] sm:$0xff]  ;;  %v1459_v35 = vld [vmem:[%s1848_s12 + $0x8] sm:$0xff] }
  0x40   : > { %v365_v33 = vpack.c.bf16 %v364_v32, %v363_v31  ;;  %v1460_v34 = vld [vmem:[%s1848_s12 + $0x10] sm:$0xff]  ;;  %v1458_v36 = vld [vmem:[%s1848_s12] sm:$0xff]  ;;  %v1187_v38 = vld [vmem:[%s1840_s8 + $0x78] sm:$0xf0] }
  0x41   : > { %v1456_v37 = vld [vmem:[%s1840_s8 + $0x74] sm:$0xf]  ;;  %v1473_v39 = vld [vmem:[%s1860_s15 + $0x38] sm:$0xff]  ;;  %v1454_v41 = vld [vmem:[%s1840_s8 + $0x64] sm:$0xf] }
  0x42   : > { %v1190_v40 = vor.u32 %v1456_v37, %v1187_v38  ;;  %v1179_v42 = vld [vmem:[%s1840_s8 + $0x68] sm:$0xf0]  ;;  %638 = vmatpush.bf16.msra.mxu3 %v1473_v39  ;;  %v1472_v43 = vld [vmem:[%s1860_s15 + $0x30] sm:$0xff]  ;;  %v1171_v46 = vld [vmem:[%s1840_s8 + $0x58] sm:$0xf0] }
  0x43   : > { %464 = vmatpush.bf16.msra.mxu0 %v1170_v11  ;;  %559 = vmatpush.bf16.msra.mxu2 %v1463_v18  ;;  %v1182_v44 = vor.u32 %v1454_v41, %v1179_v42  ;;  %v1452_v45 = vld [vmem:[%s1840_s8 + $0x54] sm:$0xf]  ;;  %v1471_v47 = vld [vmem:[%s1860_s15 + $0x28] sm:$0xff]  ;;  %v1450_v49 = vld [vmem:[%s1840_s8 + $0x44] sm:$0xf] }
  0x44   : > { %476 = vmatpush.bf16.msra.mxu1 %v1190_v40  ;;  %v1174_v48 = vor.u32 %v1452_v45, %v1171_v46  ;;  %v1163_v50 = vld [vmem:[%s1840_s8 + $0x48] sm:$0xf0]  ;;  %v1470_v51 = vld [vmem:[%s1860_s15 + $0x20] sm:$0xff]  ;;  %v1448_v53 = vld [vmem:[%s1840_s8 + $0x34] sm:$0xf] }
  0x45   : > { %v1166_v52 = vor.u32 %v1450_v49, %v1163_v50  ;;  %v1155_v54 = vld [vmem:[%s1840_s8 + $0x38] sm:$0xf0]  ;;  %v1446_v57 = vld [vmem:[%s1840_s8 + $0x24] sm:$0xf]  ;;  %v1147_v58 = vld [vmem:[%s1840_s8 + $0x28] sm:$0xf0] }
  0x46   : > { %639 = vmatpush.bf16.msra.mxu3 %v1472_v43  ;;  %v1469_v55 = vld [vmem:[%s1860_s15 + $0x18] sm:$0xff]  ;;  %v1158_v56 = vor.u32 %v1448_v53, %v1155_v54  ;;  %v1150_v60 = vor.u32 %v1446_v57, %v1147_v58  ;;  %v1468_v1 = vld [vmem:[%s1860_s15 + $0x10] sm:$0xff]  ;;  %v1467_v5 = vld [vmem:[%s1860_s15 + $0x8] sm:$0xff] }
  0x47   : > { %465 = vmatpush.bf16.msra.mxu0 %v1162_v15  ;;  %560 = vmatpush.bf16.msra.mxu2 %v1462_v22  ;;  %v1444_v2 = vld [vmem:[%s1840_s8 + $0x14] sm:$0xf]  ;;  %v1139_v3 = vld [vmem:[%s1840_s8 + $0x18] sm:$0xf0]  ;;  %v1442_v6 = vld [vmem:[%s1840_s8 + $0x4] sm:$0xf] }
  0x48   : > { %477 = vmatpush.bf16.msra.mxu1 %v1182_v44  ;;  %v1142_v4 = vor.u32 %v1444_v2, %v1139_v3  ;;  %v1131_v7 = vld [vmem:[%s1840_s8 + $0x8] sm:$0xf0]  ;;  %v1466_v9 = vld [vmem:[%s1860_s15] sm:$0xff]  ;;  %v1329_v10 = vld [vmem:[%s1840_s8 + $0xf0] sm:$0xf] }
  0x49   : > { %v1134_v8 = vor.u32 %v1442_v6, %v1131_v7  ;;  %v1489_v11 = vld [vmem:[%s1840_s8 + $0xf4] sm:$0xf0]  ;;  %v1488_v12 = vld [vmem:[%s1840_s8 + $0xf4] sm:$0xf]  ;;  %v1331_v14 = vld [vmem:[%s1840_s8 + $0xf8] sm:$0xf0] }
  0x4a   : > { %640 = vmatpush.bf16.msra.mxu3 %v1471_v47  ;;  %v1330_v13 = vor.u32 %v1489_v11, %v1329_v10  ;;  %v1321_v15 = vld [vmem:[%s1840_s8 + $0xe0] sm:$0xf]  ;;  %v1487_v16 = vld [vmem:[%s1840_s8 + $0xe4] sm:$0xf0]  ;;  %v1334_v17 = vor.u32 %v1488_v12, %v1331_v14  ;;  %v1486_v18 = vld [vmem:[%s1840_s8 + $0xe4] sm:$0xf] }
  0x4b   : > { %466 = vmatpush.bf16.msra.mxu0 %v1154_v19  ;;  %561 = vmatpush.bf16.msra.mxu2 %v1461_v26  ;;  %v1323_v19 = vld [vmem:[%s1840_s8 + $0xe8] sm:$0xf0]  ;;  %v1322_v20 = vor.u32 %v1487_v16, %v1321_v15  ;;  %v1313_v22 = vld [vmem:[%s1840_s8 + $0xd0] sm:$0xf]  ;;  %v1484_v24 = vld [vmem:[%s1840_s8 + $0xd4] sm:$0xf] }
  0x4c   : > { %478 = vmatpush.bf16.msra.mxu1 %v1174_v48  ;;  %v1326_v21 = vor.u32 %v1486_v18, %v1323_v19  ;;  %v1315_v25 = vld [vmem:[%s1840_s8 + $0xd8] sm:$0xf0]  ;;  %v1307_v37 = vld [vmem:[%s1840_s8 + $0xc8] sm:$0xf0]  ;;  %v1297_v38 = vld [vmem:[%s1840_s8 + $0xb0] sm:$0xf] }
  0x4d   : > { %v1481_v39 = vld [vmem:[%s1840_s8 + $0xb4] sm:$0xf0]  ;;  %v1480_v41 = vld [vmem:[%s1840_s8 + $0xb4] sm:$0xf]  ;;  %v1299_v42 = vld [vmem:[%s1840_s8 + $0xb8] sm:$0xf0] }
  0x4e   : > { %641 = vmatpush.bf16.msra.mxu3 %v1470_v51  ;;  %v1298_v43 = vor.u32 %v1481_v39, %v1297_v38  ;;  %v1302_v44 = vor.u32 %v1480_v41, %v1299_v42  ;;  %v1289_v45 = vld [vmem:[%s1840_s8 + $0xa0] sm:$0xf]  ;;  %v1479_v46 = vld [vmem:[%s1840_s8 + $0xa4] sm:$0xf0]  ;;  %v1478_v47 = vld [vmem:[%s1840_s8 + $0xa4] sm:$0xf] }
  0x4f   : > { %467 = vmatpush.bf16.msra.mxu0 %v1146_v23  ;;  %562 = vmatpush.bf16.msra.mxu2 %v1460_v34  ;;  %v1485_v23 = vld [vmem:[%s1840_s8 + $0xd4] sm:$0xf0]  ;;  %v1483_v34 = vld [vmem:[%s1840_s8 + $0xc4] sm:$0xf0]  ;;  %v1290_v48 = vor.u32 %v1479_v46, %v1289_v45  ;;  %v1291_v49 = vld [vmem:[%s1840_s8 + $0xa8] sm:$0xf0] }
  0x50   : > { %479 = vmatpush.bf16.msra.mxu1 %v1166_v52  ;;  %v1314_v26 = vor.u32 %v1485_v23, %v1313_v22  ;;  %v1294_v50 = vor.u32 %v1478_v47, %v1291_v49  ;;  %v1281_v51 = vld [vmem:[%s1840_s8 + $0x90] sm:$0xf]  ;;  %v1477_v52 = vld [vmem:[%s1840_s8 + $0x94] sm:$0xf0]  ;;  %v1476_v53 = vld [vmem:[%s1840_s8 + $0x94] sm:$0xf] }
  0x51   : > { %v1282_v54 = vor.u32 %v1477_v52, %v1281_v51  ;;  %v1273_v57 = vld [vmem:[%s1840_s8 + $0x80] sm:$0xf]  ;;  %v1475_v58 = vld [vmem:[%s1840_s8 + $0x84] sm:$0xf0]  ;;  %v1493_v3 = vld [vmem:[%s1848_s12 + $0x58] sm:$0xff] }
  0x52   : > { %642 = vmatpush.bf16.msra.mxu3 %v1469_v55  ;;  %v1283_v55 = vld [vmem:[%s1840_s8 + $0x98] sm:$0xf0]  ;;  %v1494_v2 = vld [vmem:[%s1848_s12 + $0x60] sm:$0xff]  ;;  %v1492_v11 = vld [vmem:[%s1848_s12 + $0x50] sm:$0xff] }
  0x53   : > { %468 = vmatpush.bf16.msra.mxu0 %v1138_v27  ;;  %563 = vmatpush.bf16.msra.mxu2 %v1459_v35  ;;  %v1318_v27 = vor.u32 %v1484_v24, %v1315_v25  ;;  %v1482_v35 = vld [vmem:[%s1840_s8 + $0xc4] sm:$0xf]  ;;  %v1491_v12 = vld [vmem:[%s1848_s12 + $0x48] sm:$0xff]  ;;  %v1505_v14 = vld [vmem:[%s1860_s15 + $0x78] sm:$0xff] }
  0x54   : > { %480 = vmatpush.bf16.msra.mxu1 %v1158_v56  ;;  %v1310_v40 = vor.u32 %v1482_v35, %v1307_v37  ;;  %v1286_v56 = vor.u32 %v1476_v53, %v1283_v55  ;;  %v1504_v15 = vld [vmem:[%s1860_s15 + $0x70] sm:$0xff]  ;;  %v1503_v16 = vld [vmem:[%s1860_s15 + $0x68] sm:$0xff]  ;;  %v1501_v18 = vld [vmem:[%s1860_s15 + $0x58] sm:$0xff] }
  0x55   : > { %v1500_v24 = vld [vmem:[%s1860_s15 + $0x50] sm:$0xff]  ;;  %v1499_v25 = vld [vmem:[%s1860_s15 + $0x48] sm:$0xff] }
  0x56   : > { %643 = vmatpush.bf16.msra.mxu3 %v1468_v1  ;;  %v1495_v1 = vld [vmem:[%s1848_s12 + $0x68] sm:$0xff] }
  0x57   : > { %469 = vmatpush.bf16.msra.mxu0 %v1130_v30  ;;  %564 = vmatpush.bf16.msra.mxu2 %v1458_v36 }
  0x58   : > { %481 = vmatpush.bf16.msra.mxu1 %v1150_v60  ;;  %v1274_v60 = vor.u32 %v1475_v58, %v1273_v57 }
  0x5a   : > { %470 = vmatmul.bf16.vlgmr.msra.gmra.mxu0 %v365_v33  ;;  %644 = vmatpush.bf16.msra.mxu3 %v1467_v5 }
  0x5b   : > { %752 = vmatpush.bf16.msrb.mxu0 %v1330_v13  ;;  %v1490_v13 = vld [vmem:[%s1848_s12 + $0x40] sm:$0xff] }
  0x5c   : > { %482 = vmatpush.bf16.msra.mxu1 %v1142_v4 }
  0x5e   : > { %645 = vmatpush.bf16.msra.mxu3 %v1466_v9 }
  0x5f   : > { %753 = vmatpush.bf16.msrb.mxu0 %v1322_v20 }
  0x60   : > { %483 = vmatpush.bf16.msra.mxu1 %v1134_v8 }
  0x62   : > { %930 = vmatpush.bf16.msrb.mxu3 %v1505_v14 }
  0x63   : > { %484 = vmatmul.bf16.vlgmr.msra.gmra.mxu1 %v365_v33  ;;  %754 = vmatpush.bf16.msrb.mxu0 %v1314_v26  ;;  %v1305_v33 = vld [vmem:[%s1840_s8 + $0xc0] sm:$0xf] }
  0x64   : > { %766 = vmatpush.bf16.msrb.mxu1 %v1334_v17  ;;  %v1306_v36 = vor.u32 %v1483_v34, %v1305_v33  ;;  %v1502_v17 = vld [vmem:[%s1860_s15 + $0x60] sm:$0xff] }
  0x65   : > { %v1498_v26 = vld [vmem:[%s1860_s15 + $0x40] sm:$0xff] }
  0x66   : > { %931 = vmatpush.bf16.msrb.mxu3 %v1504_v15 }
  0x67   : > { %755 = vmatpush.bf16.msrb.mxu0 %v1306_v36 }
  0x68   : > { %767 = vmatpush.bf16.msrb.mxu1 %v1326_v21 }
  0x6a   : > { %932 = vmatpush.bf16.msrb.mxu3 %v1503_v16 }
  0x6b   : > { %756 = vmatpush.bf16.msrb.mxu0 %v1298_v43 }
  0x6c   : > { %768 = vmatpush.bf16.msrb.mxu1 %v1318_v27 }
  0x6e   : > { %933 = vmatpush.bf16.msrb.mxu3 %v1502_v17 }
  0x6f   : > { %757 = vmatpush.bf16.msrb.mxu0 %v1290_v48 }
  0x70   : > { %769 = vmatpush.bf16.msrb.mxu1 %v1310_v40 }
  0x72   : > { %934 = vmatpush.bf16.msrb.mxu3 %v1501_v18 }
  0x73   : > { %758 = vmatpush.bf16.msrb.mxu0 %v1282_v54 }
  0x74   : > { %770 = vmatpush.bf16.msrb.mxu1 %v1302_v44 }
  0x76   : > { %935 = vmatpush.bf16.msrb.mxu3 %v1500_v24 }
  0x77   : > { %759 = vmatpush.bf16.msrb.mxu0 %v1274_v60 }
  0x78   : > { %771 = vmatpush.bf16.msrb.mxu1 %v1294_v50 }
  0x7a   : > { %936 = vmatpush.bf16.msrb.mxu3 %v1499_v25 }
  0x7c   : > { %772 = vmatpush.bf16.msrb.mxu1 %v1286_v56 }
  0x7e   : > { %937 = vmatpush.bf16.msrb.mxu3 %v1498_v26 }
  0xd7   : > { %v471_v59 = vpop.f32.mrf.mxu0 }
  0xd8   : > { %v490_v62 = vmax.f32 %v471_v59, 0.0  ;;  %v1474_v59 = vld [vmem:[%s1840_s8 + $0x84] sm:$0xf] }
  0xdf   : > { %v473_v61 = vpop.f32.mrf.mxu0 }
  0xe0   : > { %v491_v63 = vmax.f32 %v473_v61, 0.0  ;;  %v1275_v61 = vld [vmem:[%s1840_s8 + $0x88] sm:$0xf0]  ;;  %v485_v4 = vpop.f32.mrf.mxu1 }
  0xe2   : > { %v492_v0 = vpack.c.bf16 %v491_v63, %v490_v62  ;;  %v1278_v62 = vor.u32 %v1474_v59, %v1275_v61  ;;  %v1497_v63 = vld [vmem:[%s1848_s12 + $0x78] sm:$0xff] }
  0xe3   : > { %848 = vmatpush.bf16.msrb.mxu2 %v1497_v63 }
  0xe4   : > { %565 = vmatmul.bf16.vlgmr.msra.gmra.mxu2 %v492_v0  ;;  %773 = vmatpush.bf16.msrb.mxu1 %v1278_v62  ;;  %v1496_v0 = vld [vmem:[%s1848_s12 + $0x70] sm:$0xff] }
  0xe7   : > { %849 = vmatpush.bf16.msrb.mxu2 %v1496_v0 }
  0xe8   : > { %v487_v7 = vpop.f32.mrf.mxu1 }
  0xeb   : > { %850 = vmatpush.bf16.msrb.mxu2 %v1495_v1 }
  0xef   : > { %851 = vmatpush.bf16.msrb.mxu2 %v1494_v2 }
  0xf3   : > { %852 = vmatpush.bf16.msrb.mxu2 %v1493_v3 }
  0xf7   : > { %853 = vmatpush.bf16.msrb.mxu2 %v1492_v11 }
  0xfb   : > { %854 = vmatpush.bf16.msrb.mxu2 %v1491_v12 }
  0xff   : > { %855 = vmatpush.bf16.msrb.mxu2 %v1490_v13 }
 0x167   : > { %v566_v28 = vpop.f32.mrf.mxu2 }
 0x168   : > { %v571_v30 = vmax.f32 %v566_v28, 0.0 }
 0x16f   : > { %v568_v29 = vpop.f32.mrf.mxu2 }
 0x170   : > { %v572_v31 = vmax.f32 %v568_v29, 0.0 }
 0x172   : > { %v573_v32 = vpack.c.bf16 %v572_v31, %v571_v30 }
 0x174   : > { %646 = vmatmul.bf16.vlgmr.msra.gmra.mxu3 %v573_v32 }
 0x1f7   : > { %v647_v5 = vpop.f32.mrf.mxu3 }
 0x1f8   : > { %v648_v6 = vadd.f32 %v647_v5, %v485_v4 }
 0x1fa   : > { %652 = vst [vmem:[%s1858_s29] sm:$0xff] %v648_v6 }
 0x1ff   : > { %v649_v8 = vpop.f32.mrf.mxu3 }
 0x200   : > { %v650_v9 = vadd.f32 %v649_v8, %v487_v7 }
 0x202   : > { %653 = vst [vmem:[%s1858_s29 + $0x8] sm:$0xff] %v650_v9  ;;  %v654_v10 = vpack.c.bf16 %v650_v9, %v648_v6 }
 0x204   : > { %760 = vmatmul.bf16.vlgmr.msrb.gmra.mxu0 %v654_v10  ;;  %774 = vmatmul.bf16.vlgmr.msrb.gmra.mxu1 %v654_v10 }
 0x281   : > { %v761_v19 = vpop.f32.mrf.mxu0  ;;  %v775_v32 = vpop.f32.mrf.mxu1 }
 0x282   : > { %v780_v21 = vmax.f32 %v761_v19, 0.0 }
 0x289   : > { %v763_v20 = vpop.f32.mrf.mxu0  ;;  %v777_v35 = vpop.f32.mrf.mxu1 }
 0x28a   : > { %v781_v22 = vmax.f32 %v763_v20, 0.0 }
 0x28c   : > { %v782_v23 = vpack.c.bf16 %v781_v22, %v780_v21 }
 0x28e   : > { %856 = vmatmul.bf16.vlgmr.msrb.gmra.mxu2 %v782_v23 }
 0x311   : > { %v857_v27 = vpop.f32.mrf.mxu2 }
 0x312   : > { %v862_v29 = vmax.f32 %v857_v27, 0.0 }
 0x319   : > { %v859_v28 = vpop.f32.mrf.mxu2 }
 0x31a   : > { %v863_v30 = vmax.f32 %v859_v28, 0.0 }
 0x31c   : > { %v864_v31 = vpack.c.bf16 %v863_v30, %v862_v29 }
 0x31e   : > { %938 = vmatmul.bf16.vlgmr.msrb.gmra.mxu3 %v864_v31 }
 0x3a1   : > { %v939_v33 = vpop.f32.mrf.mxu3 }
 0x3a2   : > { %v940_v34 = vadd.f32 %v939_v33, %v775_v32 }
 0x3a4   : > { %1431 = vst [vmem:[%s1858_s29 + $0x10] sm:$0xff] %v940_v34 }
 0x3a5   : > { %947 = vst [vmem:[#allocation2] sm:$0xff] %v940_v34 }
 0x3a9   : > { %v941_v36 = vpop.f32.mrf.mxu3 }
 0x3aa   : > { %v942_v37 = vadd.f32 %v941_v36, %v777_v35 }
 0x3ac   : > { %1432 = vst [vmem:[%s1858_s29 + $0x18] sm:$0xff] %v942_v37 }
 0x3ad   : > { %948 = vst [vmem:[#allocation2 + $0x8] sm:$0xff] %v942_v37 }
 0x3ae PF: > { %s20_s20 = sadd.s32 1, %s1719_s20   ;;  %s2001_s15 = smov %s1703_s16 }
 0x3af   : > { %p17_p1 = scmp.ge.s32.totalorder %s20_s20, 4   ;;  %s2002_s16 = smov %s1707_s17 }
 0x3b0   : > { %s2003_s17 = smov %s1797_s26  ;;  %s2004_s18 = smov %s1715_s19 }
 0x3b1   : > { %s2005_s19 = smov %s2007_s22  ;;  %19 = sbr.rel (!%p17_p1) target bundleno = 9 (0x9), region = 111 }
 0x3b6   :  { %982 = vsyncpa [#allocation4], 1 }
 0x3b7   :  { %984 = vsyncpa [#allocation4 + $0x1], 1 }
 0x3b8   :  { %985 = vsyncpa [#allocation6], 1 }
 0x3b9   :  { %987 = vsyncpa [#allocation6 + $0x1], 1 }

</bundles_post_ra>
